<compile_context>
chip_gen: v7x
topology: tpu7x:2x2x1
jax: 0.10.0
libtpu: 0.0.40
codegen_flags: <defaults>
</compile_context>

<pallas_src>
import jax
import jax.numpy as jnp
from jax import lax
from jax.experimental import pallas as pl
from jax.experimental.pallas import tpu as pltpu


def _round_up(x, m):
    return -(-x // m) * m


def _largest_divisor_leq(n, cap):
    for d in range(max(1, min(n, cap)), 0, -1):
        if n % d == 0:
            return d
    return 1


def _cost(B, V, W, L, itemsize):
    return pl.CostEstimate(
        flops=2 * B * V * W * L,
        transcendentals=0,
        bytes_accessed=itemsize * (B * V * L + V * W + B * W * L),
    )


# --------------------------- folded (lane-dense) path ---------------------------

def _nconv_folded_kernel(at_ref, x_ref, o_ref):
    # at_ref: (W, V) adjacency (transposed), VMEM-resident across the grid
    # x_ref : (V, T) lane tile of the folded (V, B*L) input
    # o_ref : (W, T)
    o = jnp.dot(at_ref[...], x_ref[...], preferred_element_type=jnp.float32)
    o_ref[...] = o.astype(o_ref.dtype)


def _nconv_folded(x, A, lane_tile=None):
    N, C, V, L = x.shape
    _, W = A.shape
    B = N * C
    M = B * L
    itemsize = jnp.dtype(x.dtype).itemsize

    # Lane tile: as wide as a modest VMEM budget allows (lane density is the
    # dominant lever here); multiple of 128 unless one block covers everything.
    if lane_tile is None:
        lane_tile = (4 * 1024 * 1024 // max(1, (V + W) * itemsize)) // 128 * 128
        lane_tile = int(min(32768, max(512, lane_tile)))
    if M <= lane_tile:
        lane_tile = M                                    # single full-extent block
    else:
        lane_tile = max(128, (int(lane_tile) // 128) * 128)

    grid = (pl.cdiv(M, lane_tile),)                      # ragged tail masked by Pallas

    # Layout plumbing for a lane-dense slab: (N,C,V,L) -> (V, B*L); A -> A^T.
    a_t = jnp.swapaxes(A, 0, 1)                          # (W, V), tiny
    x2 = jnp.transpose(x.reshape(B, V, L), (1, 0, 2)).reshape(V, M)

    block_bytes = 2 * (V + W) * lane_tile * itemsize + 2 * V * W * itemsize
    vmem_limit = int(min(32 * 1024 * 1024,
                         max(8 * 1024 * 1024, block_bytes + 4 * 1024 * 1024)))

    out2 = pl.pallas_call(
        _nconv_folded_kernel,
        out_shape=jax.ShapeDtypeStruct((W, M), x.dtype),
        grid_spec=pltpu.PrefetchScalarGridSpec(
            num_scalar_prefetch=0,
            grid=grid,
            in_specs=[
                pl.BlockSpec((W, V), lambda i: (0, 0)),            # A^T, resident
                pl.BlockSpec((V, lane_tile), lambda i: (0, i)),    # x lane tile
            ],
            out_specs=pl.BlockSpec((W, lane_tile), lambda i: (0, i)),
        ),
        compiler_params=pltpu.CompilerParams(
            dimension_semantics=("parallel",),
            vmem_limit_bytes=vmem_limit,
        ),
        cost_estimate=_cost(B, V, W, L, itemsize),
    )(a_t, x2)

    out = jnp.transpose(out2.reshape(W, B, L), (1, 0, 2)).reshape(N, C, W, L)
    return out


# --------------------------- direct (zero-transpose) path ---------------------------

def _nconv_direct_kernel(at_ref, x_ref, o_ref):
    # at_ref: (W, V) adjacency (transposed), VMEM-resident across the grid
    # x_ref : (TB, V, L) batch tile of x
    # o_ref : (TB, W, L)
    at = at_ref[...]
    nb = x_ref.shape[0]

    def compute_one(tb):
        o = jnp.dot(at, x_ref[tb], preferred_element_type=jnp.float32)
        o_ref[tb] = o.astype(o_ref.dtype)

    if nb <= 8:
        for tb in range(nb):              # short static loop: full scheduler visibility
            compute_one(tb)
    else:
        def body(tb, carry):
            compute_one(tb)
            return carry
        lax.fori_loop(0, nb, body, 0)


def _nconv_direct(x, A, batch_tile=None):
    N, C, V, L = x.shape
    _, W = A.shape
    B = N * C
    itemsize = jnp.dtype(x.dtype).itemsize

    if batch_tile is None:
        batch_tile = 4 * 1024 * 1024 // max(1, (V + W) * L * itemsize)
        batch_tile = max(1, min(64, batch_tile))
    batch_tile = _largest_divisor_leq(B, int(batch_tile))   # exact tiling of B

    grid = (B // batch_tile,)
    a_t = jnp.swapaxes(A, 0, 1)           # (W, V), tiny
    x3 = x.reshape(B, V, L)               # free reshape, no HBM copy

    block_bytes = 2 * batch_tile * (V + W) * L * itemsize + 2 * V * W * itemsize
    vmem_limit = int(min(32 * 1024 * 1024,
                         max(8 * 1024 * 1024, block_bytes + 4 * 1024 * 1024)))

    out3 = pl.pallas_call(
        _nconv_direct_kernel,
        out_shape=jax.ShapeDtypeStruct((B, W, L), x.dtype),
        grid_spec=pltpu.PrefetchScalarGridSpec(
            num_scalar_prefetch=0,
            grid=grid,
            in_specs=[
                pl.BlockSpec((W, V), lambda i: (0, 0)),                 # A^T, resident
                pl.BlockSpec((batch_tile, V, L), lambda i: (i, 0, 0)),  # x batch tile
            ],
            out_specs=pl.BlockSpec((batch_tile, W, L), lambda i: (i, 0, 0)),
        ),
        compiler_params=pltpu.CompilerParams(
            dimension_semantics=("parallel",),
            vmem_limit_bytes=vmem_limit,
        ),
        cost_estimate=_cost(B, V, W, L, itemsize),
    )(a_t, x3)

    return out3.reshape(N, C, W, L)


# --------------------------- public wrapper ---------------------------

def nconv(x, A, *, lane_tile=None, batch_tile=None, path=None):
    """x: (N, C, V, L), A: (V, W) -> (N, C, W, L); matches torch.einsum('ncvl,vw->ncwl')."""
    N, C, V, L = x.shape
    V2, W = A.shape
    assert V2 == V, "A first dim must match x's node dim"
    if path is None:
        # Direct path reads/writes each element exactly once (no wrapper
        # transposes) but wants L lane-dense and non-trivial per-batch matmuls.
        path = "direct" if (L >= 128 and min(V, W) >= 32) else "folded"
    if path == "direct":
        return _nconv_direct(x, A, batch_tile=batch_tile)
    return _nconv_folded(x, A, lane_tile=lane_tile)


if __name__ == "__main__":
    key = jax.random.PRNGKey(0)
    k1, k2, k3, k4, k5, k6 = jax.random.split(key, 6)

    # 1) folded path, multi-step grid: batch=2, channels=4, nodes=8, seq=32
    N, C, V, L = 2, 4, 8, 32
    W = V
    x = jax.random.normal(k1, (N, C, V, L), dtype=jnp.float32)
    A = jax.random.normal(k2, (V, W), dtype=jnp.float32)
    out = nconv(x, A, lane_tile=128, path="folded")      # 2 lane tiles -> multi-step grid
    jax.block_until_ready(out)
    ref = jnp.einsum("ncvl,vw->ncwl", x, A)
    assert out.shape == (N, C, W, L)
    assert jnp.allclose(out, ref, atol=1e-4, rtol=1e-4), "mismatch vs reference (folded)"

    # 2) folded path, non-128-multiple folded extent (B*L = 160) + non-square A
    L2, W2 = 20, 12
    x_r = jax.random.normal(k3, (N, C, V, L2), dtype=jnp.float32)
    A_r = jax.random.normal(k4, (V, W2), dtype=jnp.float32)
    out_r = nconv(x_r, A_r, path="folded")
    jax.block_until_ready(out_r)
    ref_r = jnp.einsum("ncvl,vw->ncwl", x_r, A_r)
    assert out_r.shape == (N, C, W2, L2)
    assert jnp.allclose(out_r, ref_r, atol=1e-4, rtol=1e-4), "mismatch vs reference (ragged)"

    # 3) direct (zero-transpose) path: lane-dense L, larger graph
    N3, C3, V3, L3 = 2, 2, 64, 128
    x_d = jax.random.normal(k5, (N3, C3, V3, L3), dtype=jnp.float32)
    A_d = jax.random.normal(k6, (V3, V3), dtype=jnp.float32)
    out_d = nconv(x_d, A_d)                               # auto-dispatches to direct path
    jax.block_until_ready(out_d)
    ref_d = jnp.einsum("ncvl,vw->ncwl", x_d, A_d)
    assert out_d.shape == (N3, C3, V3, L3)
    assert jnp.allclose(out_d, ref_d, atol=1e-3, rtol=1e-3), "mismatch vs reference (direct)"

    print("KERNEL_OK")
</pallas_src>

<mosaic_0001>
module attributes {stable_mosaic.version = 11 : i64} {
  func.func @_nconv_folded_kernel(%arg0: i32, %arg1: memref<8x8xf32, #tpu.memory_space<vmem>>, %arg2: memref<8x128xf32, #tpu.memory_space<vmem>>, %arg3: memref<8x128xf32, #tpu.memory_space<vmem>>) attributes {dimension_semantics = [#tpu.dimension_semantics<parallel>], iteration_bounds = array<i64: 2>, scalar_prefetch = 0 : i64, scratch_operands = 0 : i64, tpu.core_type = #tpu.core_type<tc>, window_params = [{pipeline_mode = #tpu.pipeline_mode<synchronous>, transform_indices = @transform_0, window_bounds = array<i64: 8, 8>}, {transform_indices = @transform_1, window_bounds = array<i64: 8, 128>}, {transform_indices = @transform_2, window_bounds = array<i64: 8, 128>}]} {
    %c0 = arith.constant 0 : index
    %c0_0 = arith.constant 0 : index
    %0 = vector.load %arg1[%c0, %c0_0] : memref<8x8xf32, #tpu.memory_space<vmem>>, vector<8x8xf32>
    %c0_1 = arith.constant 0 : index
    %c0_2 = arith.constant 0 : index
    %1 = vector.load %arg2[%c0_1, %c0_2] : memref<8x128xf32, #tpu.memory_space<vmem>>, vector<8x128xf32>
    %cst = arith.constant dense<0.000000e+00> : vector<8x128xf32>
    %2 = tpu.matmul %0, %1, %cst {dimension_numbers = #tpu.dot_dimension_numbers<[1], [0], [0], [1], [0, 0, 1, 1], [], []>} : vector<8x8xf32>, vector<8x128xf32>, vector<8x128xf32> -> vector<8x128xf32>
    %c0_3 = arith.constant 0 : index
    %c0_4 = arith.constant 0 : index
    %3 = vector.load %arg3[%c0_3, %c0_4] : memref<8x128xf32, #tpu.memory_space<vmem>>, vector<8x128xf32>
    tpu.vector_store %arg3[%c0_3, %c0_4], %2 {strides = array<i32>} : memref<8x128xf32, #tpu.memory_space<vmem>>, vector<8x128xf32>,
    return
  }
  func.func @transform_0(%arg0: i32) -> (i32, i32) {
    %c0_i32 = arith.constant 0 : i32
    %c0_i32_0 = arith.constant 0 : i32
    %c0_i32_1 = arith.constant 0 : i32
    return %c0_i32, %c0_i32_0 : i32, i32
  }
  func.func @transform_1(%arg0: i32) -> (i32, i32) {
    %c0_i32 = arith.constant 0 : i32
    %c0_i32_0 = arith.constant 0 : i32
    return %c0_i32, %arg0 : i32, i32
  }
  func.func @transform_2(%arg0: i32) -> (i32, i32) {
    %c0_i32 = arith.constant 0 : i32
    %c0_i32_0 = arith.constant 0 : i32
    return %c0_i32, %arg0 : i32, i32
  }
}

</mosaic_0001>

<bundles_post_ra>
// kernel: tpu_custom_call.1
= control target key start
LH: loop header
LB: loop body
LE: loop exit
PB: predicated region body
PF: predicated region fallthrough
CT: control target
= control target key end

     0   :  { %7 = vsyncpa [#allocation3], 0  ;;  %s777_s0 = inlined_call_operand.hbm [shape: f32[8,8], index: 0, kind: input, shape index: {}]   ;;  %s778_s1 = inlined_call_operand.hbm [shape: f32[8,256], index: 1, kind: input, shape index: {}]   ;;  %s779_s2 = inlined_call_operand.hbm [shape: f32[8,256], index: 2, kind: output, shape index: {}]  }
   0x1   :  { %8 = vsyncpa [#allocation6], 0 }
   0x2   :  { %10 = vsyncpa [#allocation6 + $0x1], 0 }
   0x3   :  { %11 = vsyncpa [#allocation4], 0 }
   0x4   :  { %13 = vsyncpa [#allocation4 + $0x1], 0  ;;  %s576_s9 = smov 0   ;;  %s578_s10 = smov 0  }
   0x5   :  { %s580_s11 = smov 0   ;;  %s582_s12 = smov 0  }
   0x6 LB: > { %s597_s13 = sadd.s32 4294967295, %s554_s12   ;;  %s345_s14 = sadd.s32 4294967294, %s554_s12   ;;  %s554_s12 = sphi %s582_s12, %s803_s12   ;;  %s550_s11 = sphi %s580_s11, %s802_s11   ;;  %s546_s10 = sphi %s578_s10, %s801_s10   ;;  %s542_s9 = sphi %s576_s9, %s800_s9  }
   0x7   : > { %p60_p0 = scmp.ne.s32.totalorder %s546_s10, %s542_s9  ;;  %p780_p1 = scmp.eq.s32.totalorder %s597_s13, 0 }
   0x8   : > { %p90_p3 = scmp.eq.s32.totalorder %s345_s14, 1  ;;  %p346_p5 = scmp.ge.s32.totalorder %s554_s12, 1 }
   0x9   : > { %p606_p4 = por %p780_p1, %p60_p0  ;;  %p97_p7 = scmp.lt.s32.totalorder %s554_s12, 3 }
   0xa   : > { %p611_p6 = por %p90_p3, %p60_p0  ;;  %s556_s18 = smov [#allocation2]  }
   0xb   : > { %s783_s15 = scalar_select %p606_p4, 1, 0 }
   0xc   : > { %s784_s16 = scalar_select %p611_p6, 1, 0 }
   0xd   : > { %p616_p8 = pnand %p346_p5, %p97_p7  ;;  %s110_s19 = sshll.u32 %s556_s18, 4  ;;  %s111_s19 = int_to_ptr.vmem [resolvable:$true] %s110_s19 }
   0xe   : > { %s624_s20 = sadd.s32 1, %s554_s12   ;;  %s47_s24 = sadd.s32 1, %s550_s11 }
   0xf   : > { %s785_s17 = scalar_select %p616_p8, 1, 0 }
  0x10   : > { %p375_p10 = pneg %p616_p8  ;;  %s44_s22 = ssub.s32 %s554_s12, %s624_s20 }
  0x11   : > { %p634_p12 = scmp.eq.s32.totalorder %s44_s22, 0  ;;  %s426_s27 = scalar_lea.hbm %s777_s0, 128 }
  0x12   : > { %p628_p11 = pnand %p375_p10, %p780_p1  ;;  %p427_p0 = scmp.ne.s32.totalorder %s777_s0, %s426_s27 }
  0x13   : > { %s787_s23 = scalar_select %p634_p12, 1, 0 }
  0x14   : > { %p428_p3 = pneg %p628_p11  ;;  %p433_p10 = scmp.lt.u32.totalorder %s426_s27, %s777_s0 }
  0x16   : > { %p429_p5 = pnand %p428_p3, %p427_p0 }
  0x18   : > { %p430_p7 = pneg %p429_p5 }
  0x1a   : > { %p435_p9 = pnand %p433_p10, %p430_p7 }
  0x1c   : > { %438 = shalt.err (!%p435_p9)
}
  0x1d   : > { %s439_s4 = scalar_lea.vmem %s111_s19, 128  ;;  %p447_p6 = scmp.lt.s32.totalorder %s111_s19, %s111_s19 }
  0x1e   : > { %p440_p1 = scmp.ne.s32.totalorder %s111_s19, %s439_s4  ;;  %p448_p4 = scmp.lt.s32.totalorder %s439_s4, %s439_s4 }
  0x20   : > { %p442_p2 = pnand %p440_p1, %p428_p3  ;;  %p449_p8 = por %p448_p4, %p447_p6 }
  0x22   : > { %p443_p13 = pneg %p442_p2 }
  0x24   : > { %p450_p12 = pnand %p449_p8, %p443_p13 }
  0x26   : > { %453 = shalt.err (!%p450_p12)
}
  0x27   : > { %378 = dma.hbm_to_vmem [thread:$0]  (!%p628_p11), %s777_s0, 128, %s111_s19, [#allocation3]  }
  0x28   : > { %p788_p1 = scmp.ne.s32.totalorder %s787_s23, 0  ;;  %p55_p2 = scmp.eq.s32.totalorder %s554_s12, 0 }
  0x29   : > { %p789_p4 = scmp.ne.s32.totalorder %s550_s11, %s546_s10  ;;  %p790_p6 = scmp.eq.s32.totalorder %s597_s13, 1 }
  0x2a   : > { %s660_s7 = scalar_select %p788_p1, %s550_s11, %s47_s24  }
  0x2b   : > { %p668_p8 = por %p790_p6, %p789_p4  ;;  %p388_p9 = scmp.lt.s32.totalorder %s554_s12, 2 }
  0x2c   : > { %s121_s14 = sand.u32 1, %s550_s11   ;;  %p792_p12 = pmov %p789_p4 }
  0x2d   : > { %s349_s18 = sshll.u32 %s121_s14, 3  ;;  %s350_s21 = sshll.u32 %s554_s12, 7 }
  0x2e   : > { %p56_p13 = por %p55_p2, %p792_p12  ;;  %s681_s19 = scalar_lea.hbm %s778_s1, %s350_s21 }
  0x2f   : > { %s125_s23 = scalar_lea.vmem [#allocation5], %s349_s18  ;;  %s122_s27 = scalar_lea.sflag [#allocation6], %s121_s14 }
  0x30   : > { %s132_s24 = sshll.u32 %s125_s23, 4  ;;  %p683_p11 = pnand %p388_p9, %p56_p13  ;;  %s687_s24 = int_to_ptr.vmem [resolvable:$true] %s132_s24 }
  0x31   : > { %s454_s28 = scalar_lea.hbm %s681_s19, 128  ;;  %s459_s3 = scalar_lea.hbm %s778_s1, 256 }
  0x32   : > { %p455_p0 = scmp.ne.s32.totalorder %s681_s19, %s454_s28  ;;  %p456_p3 = pneg %p683_p11 }
  0x33   : > { %p460_p10 = scmp.lt.u32.totalorder %s681_s19, %s778_s1  ;;  %p461_p1 = scmp.lt.u32.totalorder %s459_s3, %s454_s28 }
  0x34   : > { %p457_p5 = pnand %p456_p3, %p455_p0  ;;  %p463_p4 = scmp.lt.u32.totalorder %s454_s28, %s681_s19 }
  0x35   : > { %p462_p2 = por %p461_p1, %p460_p10 }
  0x36   : > { %p458_p7 = pneg %p457_p5 }
  0x37   : > { %p464_p6 = por %p463_p4, %p462_p2 }
  0x39   : > { %p465_p9 = pnand %p464_p6, %p458_p7 }
  0x3b   : > { %468 = shalt.err (!%p465_p9)
}
  0x3c   : > { %s469_s6 = scalar_lea.vmem %s687_s24, 128  ;;  %s557_s14 = smov [#allocation5]  }
  0x3d   : > { %p470_p12 = scmp.ne.s32.totalorder %s687_s24, %s469_s6  ;;  %s474_s18 = sshll.u32 %s557_s14, 4  ;;  %s475_s18 = int_to_ptr.vmem [resolvable:$false] %s474_s18 }
  0x3e   : > { %s476_s21 = scalar_lea.vmem %s475_s18, 256  ;;  %p477_p5 = scmp.lt.s32.totalorder %s687_s24, %s475_s18 }
  0x3f   : > { %p472_p13 = pnand %p470_p12, %p456_p3  ;;  %p478_p10 = scmp.lt.s32.totalorder %s476_s21, %s469_s6 }
  0x41   : > { %p473_p0 = pneg %p472_p13  ;;  %p479_p1 = por %p478_p10, %p477_p5 }
  0x43   : > { %p480_p2 = pnand %p479_p1, %p473_p0 }
  0x45   : > { %483 = shalt.err (!%p480_p2)
}
  0x46   : > { %382 = dma.hbm_to_vmem [thread:$0]  (!%p683_p11), %s681_s19, 128, %s687_s24, %s122_s27  }
  0x47   : > { %p794_p7 = scmp.ne.s32.totalorder %s785_s17, 0 }
  0x48   : > { %p795_p3 = scmp.eq.s32.totalorder (!%p794_p7), %s597_s13, 0 }
  0x49   : > { %141 = sbr.rel (%p794_p7) target bundleno = 314 (0x13a), region = 28 }
  0x50   : > { %529 = dma.done.wait (%p795_p3), [#allocation3], 128   ;;  %p796_p4 = pmov %p795_p3 }
  0x51   : > { %s721_s22 = sand.u32 1, %s546_s10   ;;  %p797_p6 = scmp.ne.s32.totalorder %s783_s15, 0 }
  0x52   : > { %531 = vsyncadd (%p796_p4), [#allocation3], 4294967168  ;;  %s353_s25 = sshll.u32 %s721_s22, 3  ;;  %s148_s23 = scalar_lea.sflag [#allocation6], %s721_s22 }
  0x53   : > { %s151_s26 = scalar_lea.vmem [#allocation5], %s353_s25 }
  0x54   : > { %533 = dma.done.wait (%p797_p6), %s148_s23, 128  }
  0x55   : > { %535 = vsyncadd (%p797_p6), %s148_s23, 4294967168  ;;  %v558_v0 = vmov 0.0   ;;  %vm559_vm0 = vmmov 0   ;;  %vm174_vm1 = vcmask 64512   ;;  %v173_v1 = vld [vmem:[%s151_s26] sm:$0xff]  ;;  %v172_v2 = vld [vmem:[#allocation2] sm:$0xff] }
  0x56   : > { %362 = vmatprep.subr.mxu0 %v558_v0  ;;  %364 = vmatprep.mubr.msk.f32.mxu0 %vm559_vm0, %v558_v0  ;;  %s171_s17 = scalar_lea.vmem [#allocation7], %s353_s25  ;;  %s357_s24 = sshll.u32 %s597_s13, 7 }
  0x57   : > { %363 = vmatpush3.msra.mxu0 %v173_v1  ;;  %s263_s19 = sshll.u32 %s171_s17, 4  ;;  %s735_s28 = scalar_lea.hbm %s779_s2, %s357_s24  ;;  %s730_s19 = int_to_ptr.vmem [resolvable:$true] %s263_s19 }
  0x58   : > { %365 = vmatmul.mubr.msk.f32.vlgmr.msra.gmra.mrb[0].mxu0 %vm174_vm1, %v172_v2  ;;  %s250_s29 = scalar_lea.sflag [#allocation4], %s721_s22  ;;  %s484_s30 = scalar_lea.vmem %s730_s19, 128 }
  0x59   : > { %p485_p11 = scmp.ne.s32.totalorder %s730_s19, %s484_s30  ;;  %s560_s13 = smov [#allocation7]  }
  0x5a   : > { %s488_s3 = sshll.u32 %s560_s13, 4  ;;  %s489_s3 = int_to_ptr.vmem [resolvable:$false] %s488_s3 }
  0x5b   : > { %p486_p9 = pnand %p485_p11, %p668_p8  ;;  %s490_s4 = scalar_lea.vmem %s489_s3, 256 }
  0x5c   : > { %p491_p13 = scmp.lt.s32.totalorder %s730_s19, %s489_s3  ;;  %p492_p0 = scmp.lt.s32.totalorder %s490_s4, %s484_s30 }
  0x5d   : > { %p487_p12 = pneg %p486_p9 }
  0x5e   : > { %p493_p5 = por %p492_p0, %p491_p13 }
  0x60   : > { %p494_p10 = pnand %p493_p5, %p487_p12 }
 0x12b   : > { %v244_v3 = vpop.f32.mrb[0].mxu0 }
 0x12c   : > { %248 = vst [vmem:[%s171_s17] sm:$0xff] %v244_v3  ;;  %v366_v4 = vpop.f32.mrb[1].mxu0 }
 0x12d   : > { %497 = shalt.err (!%p494_p10)
}
 0x12e   : > { %s498_s5 = scalar_lea.hbm %s735_s28, 128  ;;  %s502_s18 = scalar_lea.hbm %s779_s2, 256 }
 0x12f   : > { %p499_p1 = scmp.ne.s32.totalorder %s735_s28, %s498_s5  ;;  %p503_p3 = scmp.lt.u32.totalorder %s735_s28, %s779_s2 }
 0x130   : > { %p504_p4 = scmp.lt.u32.totalorder %s502_s18, %s498_s5  ;;  %p506_p11 = scmp.lt.u32.totalorder %s498_s5, %s735_s28 }
 0x131   : > { %p500_p2 = pnand %p499_p1, %p668_p8 }
 0x132   : > { %p505_p6 = por %p504_p4, %p503_p3 }
 0x133   : > { %p501_p7 = pneg %p500_p2 }
 0x134   : > { %p507_p9 = por %p506_p11, %p505_p6 }
 0x136   : > { %p508_p12 = pnand %p507_p9, %p501_p7 }
 0x138   : > { %511 = shalt.err (!%p508_p12)
}
 0x139   : > { %373 = dma.vmem_to_hbm [thread:$0]  (%p668_p8), %s730_s19, 128, %s735_s28, %s250_s29  }
 0x13a PF: > { %s275_s25 = sand.u32 1, %s542_s9   ;;  %p798_p13 = scmp.ne.s32.totalorder %s784_s16, 0 }
 0x13b   : > { %p799_p0 = scmp.ge.s32.totalorder %s554_s12, 2  ;;  %s276_s23 = scalar_lea.sflag [#allocation4], %s275_s25 }
 0x13d   : > { %p384_p5 = pnand %p799_p0, %p798_p13 }
 0x13f   : > { %537 = dma.done.wait (!%p384_p5), %s276_s23, 128  }
 0x140   : > { %539 = vsyncadd (!%p384_p5), %s276_s23, 4294967168  ;;  %p16_p10 = scmp.ge.s32.totalorder %s624_s20, 4   ;;  %s800_s9 = smov %s546_s10 }
 0x141   : > { %s801_s10 = smov %s550_s11  ;;  %s802_s11 = smov %s660_s7 }
 0x142   : > { %s803_s12 = smov %s624_s20  ;;  %18 = sbr.rel (!%p16_p10) target bundleno = 6 (0x6), region = 78 }
 0x149   :  { %281 = vsyncpa [#allocation3], 1 }
 0x14a   :  { %283 = vsyncpa [#allocation3 + $0x1], 1 }
 0x14b   :  { %284 = vsyncpa [#allocation6], 1 }
 0x14c   :  { %286 = vsyncpa [#allocation6 + $0x1], 1 }
 0x14d   :  { %287 = vsyncpa [#allocation4], 1 }
 0x14e   :  { %289 = vsyncpa [#allocation4 + $0x1], 1 }

</bundles_post_ra>
